<compile_context>
chip_gen: v6e
topology: v6e:2x2x1
jax: 0.10.0
libtpu: 0.0.40
codegen_flags: <defaults>
</compile_context>

<pallas_src>
import jax
import jax.numpy as jnp
from jax.experimental import pallas as pl
from jax.experimental.pallas import tpu as pltpu


def _chain_kernel(p_ref, x_ref, o_ref):
    """p_ref: (34,) f32 SMEM scalars; x_ref: (1, LPAD) f32; o_ref: (2, LPAD)."""
    x = x_ref[...]  # (1, LPAD)

    # Stage 1: conv1 (1 -> 2 channels) + ReLU, explicit VPU FMAs.
    c0 = jnp.maximum(p_ref[0] * x + p_ref[2], 0.0)
    c1 = jnp.maximum(p_ref[1] * x + p_ref[3], 0.0)

    def affine(v0, v1, base):
        o0 = p_ref[base + 0] * v0 + p_ref[base + 1] * v1 + p_ref[base + 4]
        o1 = p_ref[base + 2] * v0 + p_ref[base + 3] * v1 + p_ref[base + 5]
        return o0, o1

    # Stages 2..5: fused 2x2 affine + ReLU.
    for base in (4, 10, 16, 22):
        c0, c1 = affine(c0, c1, base)
        c0 = jnp.maximum(c0, 0.0)
        c1 = jnp.maximum(c1, 0.0)

    # Stage 6: final affine (conv3), no ReLU.
    c0, c1 = affine(c0, c1, 28)

    o_ref[0:1, :] = c0
    o_ref[1:2, :] = c1


def model_forward(x_ncl, params):
    """x_ncl: (N, 1, L) float32, NCL layout like PyTorch Conv1d input."""
    N, Cin, L = x_ncl.shape
    assert Cin == 1
    NL = N * L
    LPAD = max(128, ((NL + 127) // 128) * 128)

    def mat(name):
        w, b = params[name]
        # PyTorch Conv1d weight (Cout, Cin, 1) -> (Cout, Cin) matrix.
        return w[:, :, 0].astype(jnp.float32), b.astype(jnp.float32)

    W1, b1 = mat("conv1"); W2, b2 = mat("conv2"); W3, b3 = mat("conv3")
    W4, b4 = mat("conv4"); W5, b5 = mat("conv5"); W6, b6 = mat("conv6")
    W7, b7 = mat("conv7")

    # Trace-time fusion of back-to-back (ReLU-free) 1x1 convs.
    Wa, ba = W4 @ W6, W4 @ b6 + b4   # conv4 ∘ conv6
    Wb, bb = W7 @ W3, W7 @ b3 + b7   # conv7 ∘ conv3
    Wc, bc = W5 @ W5, W5 @ b5 + b5   # conv5 ∘ conv5

    def pack22(W, b):
        return [W[0, 0], W[0, 1], W[1, 0], W[1, 1], b[0], b[1]]

    scalars = [W1[0, 0], W1[1, 0], b1[0], b1[1]]          # conv1 (Cin=1)
    for W, b in ((W2, b2), (Wa, ba), (Wb, bb), (Wc, bc), (W3, b3)):
        scalars += pack22(W, b)
    p = jnp.stack(scalars).astype(jnp.float32)            # (34,)

    # (N, 1, L) -> lane-dense (1, NL) row, padded to a full 128-lane width.
    x_row = x_ncl[:, 0, :].reshape(1, NL).astype(jnp.float32)
    x_pad = jnp.pad(x_row, ((0, 0), (0, LPAD - NL)))

    out_pad = pl.pallas_call(
        _chain_kernel,
        out_shape=jax.ShapeDtypeStruct((2, LPAD), jnp.float32),
        in_specs=[pl.BlockSpec(memory_space=pltpu.MemorySpace.SMEM),
                  pl.BlockSpec(memory_space=pltpu.MemorySpace.VMEM)],
        out_specs=pl.BlockSpec(memory_space=pltpu.MemorySpace.VMEM),
        cost_estimate=pl.CostEstimate(flops=6 * 6 * NL, transcendentals=0,
                                      bytes_accessed=4 * (NL + 2 * NL + 34)),
    )(p, x_pad)

    # (2, NL) -> (2, N, L) -> (N, 2, L) back to NCL.
    return jnp.transpose(out_pad[:, :NL].reshape(2, N, L), (1, 0, 2))


def init_params(key):
    """Deterministic synthetic parameters matching the PyTorch module shapes."""
    params = {}
    shapes = {
        "conv1": ((2, 1, 1), (2,)),
        "conv2": ((2, 2, 1), (2,)),
        "conv3": ((2, 2, 1), (2,)),
        "conv4": ((2, 2, 1), (2,)),
        "conv5": ((2, 2, 1), (2,)),
        "conv6": ((2, 2, 1), (2,)),
        "conv7": ((2, 2, 1), (2,)),
    }
    keys = jax.random.split(key, 2 * len(shapes))
    for i, (name, (w_shape, b_shape)) in enumerate(shapes.items()):
        fan_in = w_shape[1] * w_shape[2]
        bound = 1.0 / (fan_in ** 0.5)
        w = jax.random.uniform(keys[2 * i], w_shape, jnp.float32, -bound, bound)
        b = jax.random.uniform(keys[2 * i + 1], b_shape, jnp.float32, -bound, bound)
        params[name] = (w, b)
    return params


def _reference(x_ncl, params):
    """Pure-JAX reference of the live (unfused) dataflow, for sanity checking."""
    def conv(v, name):
        w, b = params[name]
        return jnp.einsum("ncl,oc->nol", v, w[:, :, 0]) + b[None, :, None]

    relu = lambda v: jnp.maximum(v, 0.0)
    x0 = relu(conv(x_ncl, "conv1"))
    o = conv(relu(conv(x0, "conv2")), "conv6")
    o = conv(relu(conv(o, "conv4")), "conv3")
    o = conv(relu(conv(o, "conv7")), "conv5")
    o = conv(relu(conv(o, "conv5")), "conv3")
    return o


if __name__ == "__main__":
    key = jax.random.PRNGKey(0)
    pkey, xkey = jax.random.split(key)
    params = init_params(pkey)
    x = jax.random.normal(xkey, (3, 1, 20), dtype=jnp.float32)

    out = model_forward(x, params)
    out = jax.block_until_ready(out)

    ref = _reference(x, params)
    assert out.shape == (3, 2, 20)
    assert jnp.allclose(out, ref, atol=1e-5, rtol=1e-5)
    print("KERNEL_OK")
</pallas_src>

<mosaic_0001>
module attributes {stable_mosaic.version = 11 : i64} {
  func.func @_chain_kernel(%arg0: memref<34xf32, #tpu.memory_space<smem>>, %arg1: memref<1x128xf32, #tpu.memory_space<vmem>>, %arg2: memref<2x128xf32, #tpu.memory_space<vmem>>) attributes {dimension_semantics = [], scalar_prefetch = 0 : i64, scratch_operands = 0 : i64, tpu.core_type = #tpu.core_type<tc>} {
    %c0 = arith.constant 0 : index
    %c0_0 = arith.constant 0 : index
    %0 = vector.load %arg1[%c0, %c0_0] : memref<1x128xf32, #tpu.memory_space<vmem>>, vector<1x128xf32>
    %c0_1 = arith.constant 0 : index
    %1 = memref.load %arg0[%c0_1] : memref<34xf32, #tpu.memory_space<smem>>
    %2 = vector.broadcast %1 : f32 to vector<1x128xf32>
    %3 = arith.mulf %2, %0 : vector<1x128xf32>
    %c2 = arith.constant 2 : index
    %4 = memref.load %arg0[%c2] : memref<34xf32, #tpu.memory_space<smem>>
    %5 = vector.broadcast %4 : f32 to vector<1x128xf32>
    %6 = arith.addf %3, %5 : vector<1x128xf32>
    %cst = arith.constant 0.000000e+00 : f32
    %7 = vector.broadcast %cst : f32 to vector<1x128xf32>
    %8 = arith.maximumf %6, %7 : vector<1x128xf32>
    %c1 = arith.constant 1 : index
    %9 = memref.load %arg0[%c1] : memref<34xf32, #tpu.memory_space<smem>>
    %10 = vector.broadcast %9 : f32 to vector<1x128xf32>
    %11 = arith.mulf %10, %0 : vector<1x128xf32>
    %c3 = arith.constant 3 : index
    %12 = memref.load %arg0[%c3] : memref<34xf32, #tpu.memory_space<smem>>
    %13 = vector.broadcast %12 : f32 to vector<1x128xf32>
    %14 = arith.addf %11, %13 : vector<1x128xf32>
    %cst_2 = arith.constant 0.000000e+00 : f32
    %15 = vector.broadcast %cst_2 : f32 to vector<1x128xf32>
    %16 = arith.maximumf %14, %15 : vector<1x128xf32>
    %c4 = arith.constant 4 : index
    %17 = memref.load %arg0[%c4] : memref<34xf32, #tpu.memory_space<smem>>
    %18 = vector.broadcast %17 : f32 to vector<1x128xf32>
    %19 = arith.mulf %18, %8 : vector<1x128xf32>
    %c5 = arith.constant 5 : index
    %20 = memref.load %arg0[%c5] : memref<34xf32, #tpu.memory_space<smem>>
    %21 = vector.broadcast %20 : f32 to vector<1x128xf32>
    %22 = arith.mulf %21, %16 : vector<1x128xf32>
    %23 = arith.addf %19, %22 : vector<1x128xf32>
    %c8 = arith.constant 8 : index
    %24 = memref.load %arg0[%c8] : memref<34xf32, #tpu.memory_space<smem>>
    %25 = vector.broadcast %24 : f32 to vector<1x128xf32>
    %26 = arith.addf %23, %25 : vector<1x128xf32>
    %c6 = arith.constant 6 : index
    %27 = memref.load %arg0[%c6] : memref<34xf32, #tpu.memory_space<smem>>
    %28 = vector.broadcast %27 : f32 to vector<1x128xf32>
    %29 = arith.mulf %28, %8 : vector<1x128xf32>
    %c7 = arith.constant 7 : index
    %30 = memref.load %arg0[%c7] : memref<34xf32, #tpu.memory_space<smem>>
    %31 = vector.broadcast %30 : f32 to vector<1x128xf32>
    %32 = arith.mulf %31, %16 : vector<1x128xf32>
    %33 = arith.addf %29, %32 : vector<1x128xf32>
    %c9 = arith.constant 9 : index
    %34 = memref.load %arg0[%c9] : memref<34xf32, #tpu.memory_space<smem>>
    %35 = vector.broadcast %34 : f32 to vector<1x128xf32>
    %36 = arith.addf %33, %35 : vector<1x128xf32>
    %cst_3 = arith.constant 0.000000e+00 : f32
    %37 = vector.broadcast %cst_3 : f32 to vector<1x128xf32>
    %38 = arith.maximumf %26, %37 : vector<1x128xf32>
    %cst_4 = arith.constant 0.000000e+00 : f32
    %39 = vector.broadcast %cst_4 : f32 to vector<1x128xf32>
    %40 = arith.maximumf %36, %39 : vector<1x128xf32>
    %c10 = arith.constant 10 : index
    %41 = memref.load %arg0[%c10] : memref<34xf32, #tpu.memory_space<smem>>
    %42 = vector.broadcast %41 : f32 to vector<1x128xf32>
    %43 = arith.mulf %42, %38 : vector<1x128xf32>
    %c11 = arith.constant 11 : index
    %44 = memref.load %arg0[%c11] : memref<34xf32, #tpu.memory_space<smem>>
    %45 = vector.broadcast %44 : f32 to vector<1x128xf32>
    %46 = arith.mulf %45, %40 : vector<1x128xf32>
    %47 = arith.addf %43, %46 : vector<1x128xf32>
    %c14 = arith.constant 14 : index
    %48 = memref.load %arg0[%c14] : memref<34xf32, #tpu.memory_space<smem>>
    %49 = vector.broadcast %48 : f32 to vector<1x128xf32>
    %50 = arith.addf %47, %49 : vector<1x128xf32>
    %c12 = arith.constant 12 : index
    %51 = memref.load %arg0[%c12] : memref<34xf32, #tpu.memory_space<smem>>
    %52 = vector.broadcast %51 : f32 to vector<1x128xf32>
    %53 = arith.mulf %52, %38 : vector<1x128xf32>
    %c13 = arith.constant 13 : index
    %54 = memref.load %arg0[%c13] : memref<34xf32, #tpu.memory_space<smem>>
    %55 = vector.broadcast %54 : f32 to vector<1x128xf32>
    %56 = arith.mulf %55, %40 : vector<1x128xf32>
    %57 = arith.addf %53, %56 : vector<1x128xf32>
    %c15 = arith.constant 15 : index
    %58 = memref.load %arg0[%c15] : memref<34xf32, #tpu.memory_space<smem>>
    %59 = vector.broadcast %58 : f32 to vector<1x128xf32>
    %60 = arith.addf %57, %59 : vector<1x128xf32>
    %cst_5 = arith.constant 0.000000e+00 : f32
    %61 = vector.broadcast %cst_5 : f32 to vector<1x128xf32>
    %62 = arith.maximumf %50, %61 : vector<1x128xf32>
    %cst_6 = arith.constant 0.000000e+00 : f32
    %63 = vector.broadcast %cst_6 : f32 to vector<1x128xf32>
    %64 = arith.maximumf %60, %63 : vector<1x128xf32>
    %c16 = arith.constant 16 : index
    %65 = memref.load %arg0[%c16] : memref<34xf32, #tpu.memory_space<smem>>
    %66 = vector.broadcast %65 : f32 to vector<1x128xf32>
    %67 = arith.mulf %66, %62 : vector<1x128xf32>
    %c17 = arith.constant 17 : index
    %68 = memref.load %arg0[%c17] : memref<34xf32, #tpu.memory_space<smem>>
    %69 = vector.broadcast %68 : f32 to vector<1x128xf32>
    %70 = arith.mulf %69, %64 : vector<1x128xf32>
    %71 = arith.addf %67, %70 : vector<1x128xf32>
    %c20 = arith.constant 20 : index
    %72 = memref.load %arg0[%c20] : memref<34xf32, #tpu.memory_space<smem>>
    %73 = vector.broadcast %72 : f32 to vector<1x128xf32>
    %74 = arith.addf %71, %73 : vector<1x128xf32>
    %c18 = arith.constant 18 : index
    %75 = memref.load %arg0[%c18] : memref<34xf32, #tpu.memory_space<smem>>
    %76 = vector.broadcast %75 : f32 to vector<1x128xf32>
    %77 = arith.mulf %76, %62 : vector<1x128xf32>
    %c19 = arith.constant 19 : index
    %78 = memref.load %arg0[%c19] : memref<34xf32, #tpu.memory_space<smem>>
    %79 = vector.broadcast %78 : f32 to vector<1x128xf32>
    %80 = arith.mulf %79, %64 : vector<1x128xf32>
    %81 = arith.addf %77, %80 : vector<1x128xf32>
    %c21 = arith.constant 21 : index
    %82 = memref.load %arg0[%c21] : memref<34xf32, #tpu.memory_space<smem>>
    %83 = vector.broadcast %82 : f32 to vector<1x128xf32>
    %84 = arith.addf %81, %83 : vector<1x128xf32>
    %cst_7 = arith.constant 0.000000e+00 : f32
    %85 = vector.broadcast %cst_7 : f32 to vector<1x128xf32>
    %86 = arith.maximumf %74, %85 : vector<1x128xf32>
    %cst_8 = arith.constant 0.000000e+00 : f32
    %87 = vector.broadcast %cst_8 : f32 to vector<1x128xf32>
    %88 = arith.maximumf %84, %87 : vector<1x128xf32>
    %c22 = arith.constant 22 : index
    %89 = memref.load %arg0[%c22] : memref<34xf32, #tpu.memory_space<smem>>
    %90 = vector.broadcast %89 : f32 to vector<1x128xf32>
    %91 = arith.mulf %90, %86 : vector<1x128xf32>
    %c23 = arith.constant 23 : index
    %92 = memref.load %arg0[%c23] : memref<34xf32, #tpu.memory_space<smem>>
    %93 = vector.broadcast %92 : f32 to vector<1x128xf32>
    %94 = arith.mulf %93, %88 : vector<1x128xf32>
    %95 = arith.addf %91, %94 : vector<1x128xf32>
    %c26 = arith.constant 26 : index
    %96 = memref.load %arg0[%c26] : memref<34xf32, #tpu.memory_space<smem>>
    %97 = vector.broadcast %96 : f32 to vector<1x128xf32>
    %98 = arith.addf %95, %97 : vector<1x128xf32>
    %c24 = arith.constant 24 : index
    %99 = memref.load %arg0[%c24] : memref<34xf32, #tpu.memory_space<smem>>
    %100 = vector.broadcast %99 : f32 to vector<1x128xf32>
    %101 = arith.mulf %100, %86 : vector<1x128xf32>
    %c25 = arith.constant 25 : index
    %102 = memref.load %arg0[%c25] : memref<34xf32, #tpu.memory_space<smem>>
    %103 = vector.broadcast %102 : f32 to vector<1x128xf32>
    %104 = arith.mulf %103, %88 : vector<1x128xf32>
    %105 = arith.addf %101, %104 : vector<1x128xf32>
    %c27 = arith.constant 27 : index
    %106 = memref.load %arg0[%c27] : memref<34xf32, #tpu.memory_space<smem>>
    %107 = vector.broadcast %106 : f32 to vector<1x128xf32>
    %108 = arith.addf %105, %107 : vector<1x128xf32>
    %cst_9 = arith.constant 0.000000e+00 : f32
    %109 = vector.broadcast %cst_9 : f32 to vector<1x128xf32>
    %110 = arith.maximumf %98, %109 : vector<1x128xf32>
    %cst_10 = arith.constant 0.000000e+00 : f32
    %111 = vector.broadcast %cst_10 : f32 to vector<1x128xf32>
    %112 = arith.maximumf %108, %111 : vector<1x128xf32>
    %c28 = arith.constant 28 : index
    %113 = memref.load %arg0[%c28] : memref<34xf32, #tpu.memory_space<smem>>
    %114 = vector.broadcast %113 : f32 to vector<1x128xf32>
    %115 = arith.mulf %114, %110 : vector<1x128xf32>
    %c29 = arith.constant 29 : index
    %116 = memref.load %arg0[%c29] : memref<34xf32, #tpu.memory_space<smem>>
    %117 = vector.broadcast %116 : f32 to vector<1x128xf32>
    %118 = arith.mulf %117, %112 : vector<1x128xf32>
    %119 = arith.addf %115, %118 : vector<1x128xf32>
    %c32 = arith.constant 32 : index
    %120 = memref.load %arg0[%c32] : memref<34xf32, #tpu.memory_space<smem>>
    %121 = vector.broadcast %120 : f32 to vector<1x128xf32>
    %122 = arith.addf %119, %121 : vector<1x128xf32>
    %c30 = arith.constant 30 : index
    %123 = memref.load %arg0[%c30] : memref<34xf32, #tpu.memory_space<smem>>
    %124 = vector.broadcast %123 : f32 to vector<1x128xf32>
    %125 = arith.mulf %124, %110 : vector<1x128xf32>
    %c31 = arith.constant 31 : index
    %126 = memref.load %arg0[%c31] : memref<34xf32, #tpu.memory_space<smem>>
    %127 = vector.broadcast %126 : f32 to vector<1x128xf32>
    %128 = arith.mulf %127, %112 : vector<1x128xf32>
    %129 = arith.addf %125, %128 : vector<1x128xf32>
    %c33 = arith.constant 33 : index
    %130 = memref.load %arg0[%c33] : memref<34xf32, #tpu.memory_space<smem>>
    %131 = vector.broadcast %130 : f32 to vector<1x128xf32>
    %132 = arith.addf %129, %131 : vector<1x128xf32>
    %c0_11 = arith.constant 0 : index
    %c0_12 = arith.constant 0 : index
    %133 = vector.load %arg2[%c0_11, %c0_12] : memref<2x128xf32, #tpu.memory_space<vmem>>, vector<1x128xf32>
    tpu.vector_store %arg2[%c0_11, %c0_12], %122 {strides = array<i32>} : memref<2x128xf32, #tpu.memory_space<vmem>>, vector<1x128xf32>,
    %c1_13 = arith.constant 1 : index
    %c0_14 = arith.constant 0 : index
    %134 = vector.load %arg2[%c1_13, %c0_14] : memref<2x128xf32, #tpu.memory_space<vmem>>, vector<1x128xf32>
    tpu.vector_store %arg2[%c1_13, %c0_14], %132 {strides = array<i32>} : memref<2x128xf32, #tpu.memory_space<vmem>>, vector<1x128xf32>,
    return
  }
}

</mosaic_0001>

<bundles_post_ra>
// kernel: tpu_custom_call.1
= control target key start
LH: loop header
LB: loop body
LE: loop exit
PB: predicated region body
PF: predicated region fallthrough
CT: control target
= control target key end

     0   :  { %7 = vsyncpa [#allocation4], 0  ;;  %s277_s0 = inlined_call_operand.hbm [shape: f32[34], index: 0, kind: input, shape index: {}]   ;;  %s278_s1 = inlined_call_operand.vmem [shape: f32[1,128], index: 1, kind: input, shape index: {}]   ;;  %s279_s2 = inlined_call_operand.hbm [shape: f32[2,128], index: 2, kind: output, shape index: {}]  }
   0x1   :  { %8 = vsyncpa [#allocation3], 0  ;;  %s230_s9 = smov [#allocation2]  }
   0x2   :  { %16 = dma.hbm_to_smem %s277_s0, 16, %s230_s9, [#allocation4]  }
   0x3   :  { %226 = dma.done.wait [#allocation4], 16  }
   0x4   :  { %227 = vsyncadd [#allocation4], 4294967280 }
   0x5   :  { %22 = sfence }
   0x6   :  { %s24_s12 = sld [smem:[#allocation2]]  ;;  %v23_v0 = vld [vmem:[%s278_s1] sm:$0x1] }
   0x7   :  { %s163_s13 = sld [smem:[#allocation2 + $0x2]] }
   0x8   :  { %s164_s14 = sld [smem:[#allocation2 + $0x1]] }
   0x9   :  { %s165_s15 = sld [smem:[#allocation2 + $0x3]] }
   0xa   :  { %s166_s18 = sld [smem:[#allocation2 + $0x4]] }
   0xb   :  { %s167_s19 = sld [smem:[#allocation2 + $0x5]] }
   0xc   :  { %v25_v1 = vstv %s24_s12  ;;  %s253_s20 = sld [smem:[#allocation2 + $0x8]] }
   0xd   :  { %v26_v2 = vmul.f32 %v25_v1, %v23_v0  ;;  %v28_v3 = vstv %s163_s13  ;;  %s169_s21 = sld [smem:[#allocation2 + $0x6]] }
   0xe   :  { %v32_v4 = vstv %s164_s14  ;;  %s170_s0 = sld [smem:[#allocation2 + $0x7]] }
   0xf   :  { %v29_v5 = vadd.f32 %v28_v3, %v26_v2  ;;  %v33_v6 = vmul.f32 %v32_v4, %v23_v0  ;;  %v35_v7 = vstv %s165_s15  ;;  %s171_s22 = sld [smem:[#allocation2 + $0x9]] }
  0x10   :  { %v39_v8 = vstv %s166_s18  ;;  %s172_s23 = sld [smem:[#allocation2 + $0xa]]  ;;  %s231_s18 = smov [#allocation5]  }
  0x11   :  { %v30_v9 = vmax.f32 %v29_v5, 0.0  ;;  %v36_v10 = vadd.f32 %v35_v7, %v33_v6  ;;  %v42_v11 = vstv %s167_s19  ;;  %s173_s1 = sld [smem:[#allocation2 + $0xb]]  ;;  %s154_s19 = sshll.u32 %s231_s18, 4  ;;  %s155_s19 = int_to_ptr.vmem [resolvable:$true] %s154_s19 }
  0x12   :  { %s175_s24 = sld [smem:[#allocation2 + $0xc]]  ;;  %v46_v19 = vstv %s253_s20  ;;  %s206_s20 = scalar_lea.vmem %s155_s19, 32 }
  0x13   :  { %v37_v12 = vmax.f32 %v36_v10, 0.0  ;;  %v40_v13 = vmul.f32 %v39_v8, %v30_v9  ;;  %v49_v14 = vstv %s169_s21  ;;  %s176_s25 = sld [smem:[#allocation2 + $0xd]]  ;;  %p207_p0 = scmp.ne.s32.totalorder %s155_s19, %s206_s20 }
  0x14   :  { %v50_v15 = vmul.f32 %v49_v14, %v30_v9  ;;  %v52_v16 = vstv %s170_s0  ;;  %s174_s26 = sld [smem:[#allocation2 + $0xe]]  ;;  %p211_p1 = scmp.lt.s32.totalorder %s155_s19, %s155_s19 }
  0x15   :  { %v43_v17 = vmul.f32 %v42_v11, %v37_v12  ;;  %v53_v18 = vmul.f32 %v52_v16, %v37_v12  ;;  %v56_v20 = vstv %s171_s22  ;;  %s177_s27 = sld [smem:[#allocation2 + $0xf]]  ;;  %p212_p2 = scmp.lt.s32.totalorder %s206_s20, %s206_s20 }
  0x16   :  { %s256_s28 = sld [smem:[#allocation2 + $0x10]]  ;;  %v61_v25 = vstv %s172_s23 }
  0x17   :  { %v44_v21 = vadd.f32 %v43_v17, %v40_v13  ;;  %v54_v22 = vadd.f32 %v53_v18, %v50_v15  ;;  %s258_s29 = sld [smem:[#allocation2 + $0x11]]  ;;  %v64_v26 = vstv %s173_s1  ;;  %p213_p3 = por %p212_p2, %p211_p1 }
  0x18   :  { %s260_s30 = sld [smem:[#allocation2 + $0x12]]  ;;  %v71_v27 = vstv %s175_s24 }
  0x19   :  { %v47_v23 = vadd.f32 %v46_v19, %v44_v21  ;;  %v57_v24 = vadd.f32 %v56_v20, %v54_v22  ;;  %v74_v28 = vstv %s176_s25  ;;  %s182_s3 = sld [smem:[#allocation2 + $0x13]]  ;;  %p214_p4 = pnand %p213_p3, %p207_p0 }
  0x1a   :  { %s180_s4 = sld [smem:[#allocation2 + $0x14]]  ;;  %v68_v35 = vstv %s174_s26 }
  0x1b   :  { %v58_v29 = vmax.f32 %v47_v23, 0.0  ;;  %v59_v30 = vmax.f32 %v57_v24, 0.0  ;;  %v78_v36 = vstv %s177_s27  ;;  %s183_s5 = sld [smem:[#allocation2 + $0x15]] }
  0x1c   :  { %s262_s6 = sld [smem:[#allocation2 + $0x16]]  ;;  %v83_v41 = vstv %s256_s28 }
  0x1d   :  { %v62_v31 = vmul.f32 %v61_v25, %v58_v29  ;;  %v65_v32 = vmul.f32 %v64_v26, %v59_v30  ;;  %v72_v33 = vmul.f32 %v71_v27, %v58_v29  ;;  %v75_v34 = vmul.f32 %v74_v28, %v59_v30  ;;  %s264_s7 = sld [smem:[#allocation2 + $0x17]] }
  0x1e   :  { %s266_s8 = sld [smem:[#allocation2 + $0x18]]  ;;  %v86_v42 = vstv %s258_s29  ;;  %v93_v43 = vstv %s260_s30 }
  0x1f   :  { %v66_v37 = vadd.f32 %v65_v32, %v62_v31  ;;  %v76_v38 = vadd.f32 %v75_v34, %v72_v33  ;;  %v96_v44 = vstv %s182_s3  ;;  %s188_s9 = sld [smem:[#allocation2 + $0x19]] }
  0x20   :  { %s186_s10 = sld [smem:[#allocation2 + $0x1a]]  ;;  %v90_v51 = vstv %s180_s4 }
  0x21   :  { %v69_v39 = vadd.f32 %v68_v35, %v66_v37  ;;  %v79_v40 = vadd.f32 %v78_v36, %v76_v38  ;;  %v100_v52 = vstv %s183_s5  ;;  %s189_s11 = sld [smem:[#allocation2 + $0x1b]] }
  0x22   :  { %s190_s12 = sld [smem:[#allocation2 + $0x1c]]  ;;  %v105_v57 = vstv %s262_s6 }
  0x23   :  { %v80_v45 = vmax.f32 %v69_v39, 0.0  ;;  %v81_v46 = vmax.f32 %v79_v40, 0.0  ;;  %s191_s13 = sld [smem:[#allocation2 + $0x1d]]  ;;  %v108_v58 = vstv %s264_s7 }
  0x24   :  { %s193_s14 = sld [smem:[#allocation2 + $0x1e]]  ;;  %v115_v59 = vstv %s266_s8 }
  0x25   :  { %v84_v47 = vmul.f32 %v83_v41, %v80_v45  ;;  %v87_v48 = vmul.f32 %v86_v42, %v81_v46  ;;  %v94_v49 = vmul.f32 %v93_v43, %v80_v45  ;;  %v97_v50 = vmul.f32 %v96_v44, %v81_v46  ;;  %s194_s15 = sld [smem:[#allocation2 + $0x1f]] }
  0x26   :  { %v118_v60 = vstv %s188_s9  ;;  %s192_s16 = sld [smem:[#allocation2 + $0x20]]  ;;  %v112_v3 = vstv %s186_s10 }
  0x27   :  { %v88_v53 = vadd.f32 %v87_v48, %v84_v47  ;;  %v98_v54 = vadd.f32 %v97_v50, %v94_v49  ;;  %v122_v4 = vstv %s189_s11  ;;  %s195_s17 = sld [smem:[#allocation2 + $0x21]] }
  0x28   :  { %v127_v9 = vstv %s190_s12 }
  0x29   :  { %v91_v55 = vadd.f32 %v90_v51, %v88_v53  ;;  %v101_v56 = vadd.f32 %v100_v52, %v98_v54  ;;  %v130_v10 = vstv %s191_s13 }
  0x2a   :  { %v137_v11 = vstv %s193_s14 }
  0x2b   :  { %v102_v61 = vmax.f32 %v91_v55, 0.0  ;;  %v103_v62 = vmax.f32 %v101_v56, 0.0  ;;  %v140_v12 = vstv %s194_s15 }
  0x2c   :  { %v134_v19 = vstv %s192_s16 }
  0x2d   :  { %v106_v63 = vmul.f32 %v105_v57, %v102_v61  ;;  %v109_v0 = vmul.f32 %v108_v58, %v103_v62  ;;  %v116_v1 = vmul.f32 %v115_v59, %v102_v61  ;;  %v119_v2 = vmul.f32 %v118_v60, %v103_v62 }
  0x2e   :  { %v144_v20 = vstv %s195_s17 }
  0x2f   :  { %v110_v5 = vadd.f32 %v109_v0, %v106_v63  ;;  %v120_v6 = vadd.f32 %v119_v2, %v116_v1 }
  0x31   :  { %v113_v7 = vadd.f32 %v112_v3, %v110_v5  ;;  %v123_v8 = vadd.f32 %v122_v4, %v120_v6 }
  0x33   :  { %v124_v13 = vmax.f32 %v113_v7, 0.0  ;;  %v125_v14 = vmax.f32 %v123_v8, 0.0 }
  0x35   :  { %v128_v15 = vmul.f32 %v127_v9, %v124_v13  ;;  %v131_v16 = vmul.f32 %v130_v10, %v125_v14  ;;  %v138_v17 = vmul.f32 %v137_v11, %v124_v13  ;;  %v141_v18 = vmul.f32 %v140_v12, %v125_v14 }
  0x37   :  { %v132_v21 = vadd.f32 %v131_v16, %v128_v15  ;;  %v142_v22 = vadd.f32 %v141_v18, %v138_v17 }
  0x39   :  { %v135_v23 = vadd.f32 %v134_v19, %v132_v21  ;;  %v145_v24 = vadd.f32 %v144_v20, %v142_v22 }
  0x3b   :  { %146 = vst [vmem:[#allocation5] sm:$0x1] %v135_v23  ;;  %147 = vst [vmem:[#allocation5 + $0x1] sm:$0x1] %v145_v24 }
  0x3c   :  { %217 = shalt.err (!%p214_p4)
}
  0x3d   :  { %157 = dma.vmem_to_hbm [thread:$0]  %s155_s19, 32, %s279_s2, [#allocation3]  }
  0x3e   :  { %228 = dma.done.wait [#allocation3], 32  }
  0x3f   :  { %229 = vsyncadd [#allocation3], 4294967264 }
  0x40   :  { %161 = vsyncpa [#allocation3], 1 }
  0x41   :  { %162 = vsyncpa [#allocation4], 1 }

</bundles_post_ra>
